<compile_context>
chip_gen: v6e
topology: v6e:2x2x1
jax: 0.10.0
libtpu: 0.0.40
codegen_flags: <defaults>
</compile_context>

<pallas_src>
import jax
import jax.numpy as jnp
from jax.experimental import pallas as pl
from jax.experimental.pallas import tpu as pltpu


def _lmhead_kernel(x_ref, w_ref, b_ref, o_ref, acc_ref):
    # x_ref: (tm, tk)  w_ref: (tk, tn)  b_ref: (1, tn)  o_ref: (tm, tn)
    # acc_ref: (tm, tn) f32 VMEM accumulator, resident across the K axis.
    k = pl.program_id(2)

    @pl.when(k == 0)
    def _init():
        acc_ref[...] = jnp.zeros_like(acc_ref)

    acc_ref[...] += jnp.dot(x_ref[...], w_ref[...],
                            preferred_element_type=jnp.float32)

    @pl.when(k == pl.num_programs(2) - 1)
    def _finalize():
        o_ref[...] = (acc_ref[...]
                      + b_ref[...].astype(jnp.float32)).astype(o_ref.dtype)


def _round_up(a, b):
    return ((a + b - 1) // b) * b


def _sublane_multiple(dtype):
    # f32 -> 8, bf16 -> 16, int8/fp8 -> 32 (sub-32-bit dtypes pack sublanes).
    return max(8, 32 // jnp.dtype(dtype).itemsize)


def _vmem_capacity_bytes():
    try:
        return int(pltpu.get_tpu_info().vmem_capacity_bytes)
    except Exception:
        return 64 << 20  # conservative: v7x per-TensorCore VMEM


def lm_head(x, weight, bias, *, tm=None, tn=None, tk=None, out_dtype=None):
    """LMHead forward: (B, S, E) @ (E, V) + (V,) -> (B, S, V).

    weight is stored (E, V) (transposed vs. torch.nn.Linear's (V, E)).
    Fast path for big vocabularies: pass bf16 x/weight (out_dtype bf16 or f32);
    accumulation is always f32 via preferred_element_type, halving weight HBM
    traffic while keeping MXU-native throughput.
    """
    B, S, E = x.shape
    Ew, V = weight.shape
    assert Ew == E, "weight must be (embedding_dimension, number_of_tokens)"
    assert bias.shape == (V,)
    out_dtype = out_dtype or x.dtype
    M = B * S

    x_it = jnp.dtype(x.dtype).itemsize
    w_it = jnp.dtype(weight.dtype).itemsize
    b_it = jnp.dtype(bias.dtype).itemsize
    o_it = jnp.dtype(out_dtype).itemsize

    cap = _vmem_capacity_bytes()
    headroom = (16 << 20) if cap >= (96 << 20) else (12 << 20)
    usable = max(cap - headroom, 24 << 20)
    budget = usable - (4 << 20)  # allowance for Mosaic internal scratch

    def blk_bytes(_tm, _tn, _tk):
        # Double-buffered x / weight / bias / out tiles + single f32 accumulator.
        return (2 * (_tm * _tk * x_it + _tk * _tn * w_it + _tn * b_it
                     + _tm * _tn * o_it) + _tm * _tn * 4)

    # --- K (embedding) tile: must divide E so no padded garbage enters the
    #     accumulation; whole E when small. ---
    if tk is None:
        tk = E
        if E > 2048:
            for cand in (2048, 1024, 512, 256, 128):
                if E % cand == 0:
                    tk = cand
                    break
            # TODO(synk): if E has no 128-multiple divisor <= 2048, tk falls
            # back to E (correct, just a larger per-step x/weight tile).
    assert E % tk == 0

    # --- V (vocab) tile: divisor of round_up(V, 128), so the full weight is
    #     never re-padded (pad < 128 columns only when V % 128 != 0). ---
    V128 = _round_up(V, 128)
    if tn is None:
        tn = 128
        for cand in (1024, 512, 256, 128):
            if V128 % cand == 0:
                tn = cand
                break

    # --- M (rows) tile: weight bytes are re-streamed M/tm times, so size tm
    #     off the compute/bandwidth roofline, clamped to problem + VMEM. ---
    m_align = max(_sublane_multiple(x.dtype), _sublane_multiple(out_dtype))
    if tm is None:
        target = 1024 if cap >= (96 << 20) else 512   # v5e/v6e : v7x
        if min(x_it, w_it) >= 4:
            target *= 2                               # f32 streams 2x the bytes
        tm = min(target, _round_up(M, m_align))
    tm = max(_round_up(tm, m_align), m_align)

    # Shrink tm (then tn) until the double-buffered tiles fit the VMEM budget.
    while blk_bytes(tm, tn, tk) > budget and tm > m_align:
        tm = max(_round_up(tm // 2, m_align), m_align)
    while blk_bytes(tm, tn, tk) > budget and tn > 128:
        tn //= 2

    M_pad = _round_up(M, tm)
    V_pad = V128  # tn divides V128 by construction

    x2d = x.reshape(M, E)
    if M_pad != M:
        x2d = jnp.pad(x2d, ((0, M_pad - M), (0, 0)))
    w = weight
    b2d = bias.reshape(1, V)
    if V_pad != V:
        # Only when V is not a multiple of 128 (pad is < 128 columns).
        # TODO(synk): pre-pad weight/bias once at parameter-init time to avoid
        # this per-call copy for non-128-multiple vocabularies.
        w = jnp.pad(w, ((0, 0), (0, V_pad - V)))
        b2d = jnp.pad(b2d, ((0, 0), (0, V_pad - V)))

    vmem_limit = int(min(max(blk_bytes(tm, tn, tk) + (6 << 20), 32 << 20),
                         usable))

    cost = pl.CostEstimate(
        flops=2 * M_pad * E * V_pad,
        transcendentals=0,
        bytes_accessed=(M_pad * E * x_it + E * V_pad * w_it + V_pad * b_it
                        + M_pad * V_pad * o_it),
    )

    out2d = pl.pallas_call(
        _lmhead_kernel,
        out_shape=jax.ShapeDtypeStruct((M_pad, V_pad), out_dtype),
        grid_spec=pltpu.PrefetchScalarGridSpec(
            num_scalar_prefetch=0,
            grid=(M_pad // tm, V_pad // tn, E // tk),
            in_specs=[
                pl.BlockSpec((tm, tk), lambda i, j, k: (i, k)),  # activations
                pl.BlockSpec((tk, tn), lambda i, j, k: (k, j)),  # weight cols
                pl.BlockSpec((1, tn), lambda i, j, k: (0, j)),   # bias cols
            ],
            out_specs=pl.BlockSpec((tm, tn), lambda i, j, k: (i, j)),
            scratch_shapes=[pltpu.VMEM((tm, tn), jnp.float32)],
        ),
        compiler_params=pltpu.CompilerParams(
            dimension_semantics=("parallel", "parallel", "arbitrary"),
            vmem_limit_bytes=vmem_limit,
        ),
        cost_estimate=cost,
    )(x2d, w, b2d)

    if M_pad != M or V_pad != V:
        out2d = out2d[:M, :V]
    return out2d.reshape(B, S, V)


if __name__ == "__main__":
    # Small shapes consistent with the module's forward contract.
    batch, seq, embed_dim, vocab = 2, 8, 32, 256

    key = jax.random.PRNGKey(0)
    kx, kw, kb = jax.random.split(key, 3)

    x = jax.random.normal(kx, (batch, seq, embed_dim), dtype=jnp.float32)
    # Deterministic parameter init (torch.nn.Linear-style uniform bound 1/sqrt(E)).
    bound = 1.0 / (embed_dim ** 0.5)
    weight = jax.random.uniform(kw, (embed_dim, vocab), minval=-bound,
                                maxval=bound, dtype=jnp.float32)
    bias = jax.random.uniform(kb, (vocab,), minval=-bound, maxval=bound,
                              dtype=jnp.float32)

    out = lm_head(x, weight, bias)
    out = jax.block_until_ready(out)

    # Correctness check against plain-JAX reference.
    ref = x.reshape(-1, embed_dim) @ weight + bias
    ref = ref.reshape(batch, seq, vocab)
    assert out.shape == (batch, seq, vocab)
    assert jnp.allclose(out, ref, atol=1e-5, rtol=1e-5)

    print("KERNEL_OK")
</pallas_src>

<mosaic_0001>
module attributes {stable_mosaic.version = 11 : i64} {
  func.func @_lmhead_kernel(%arg0: i32, %arg1: i32, %arg2: i32, %arg3: memref<16x32xf32, #tpu.memory_space<vmem>>, %arg4: memref<32x256xf32, #tpu.memory_space<vmem>>, %arg5: memref<1x256xf32, #tpu.memory_space<vmem>>, %arg6: memref<16x256xf32, #tpu.memory_space<vmem>>, %arg7: memref<16x256xf32, #tpu.memory_space<vmem>>) attributes {dimension_semantics = [#tpu.dimension_semantics<parallel>, #tpu.dimension_semantics<parallel>, #tpu.dimension_semantics<arbitrary>], iteration_bounds = array<i64: 1, 1, 1>, scalar_prefetch = 0 : i64, scratch_operands = 1 : i64, tpu.core_type = #tpu.core_type<tc>, window_params = [{transform_indices = @transform_0, window_bounds = array<i64: 16, 32>}, {transform_indices = @transform_1, window_bounds = array<i64: 32, 256>}, {transform_indices = @transform_2, window_bounds = array<i64: 1, 256>}, {transform_indices = @transform_3, window_bounds = array<i64: 16, 256>}]} {
    %c0_i32 = arith.constant 0 : i32
    %0 = arith.cmpi eq, %arg2, %c0_i32 : i32
    %1 = arith.extui %0 : i1 to i32
    %c0_i32_0 = arith.constant 0 : i32
    %2 = arith.cmpi ne, %1, %c0_i32_0 : i32
    scf.if %2 {
      %cst_10 = arith.constant 0.000000e+00 : f32
      %12 = vector.broadcast %cst_10 : f32 to vector<16x256xf32>
      %c0_11 = arith.constant 0 : index
      %c0_12 = arith.constant 0 : index
      %13 = vector.load %arg7[%c0_11, %c0_12] : memref<16x256xf32, #tpu.memory_space<vmem>>, vector<16x256xf32>
      tpu.vector_store %arg7[%c0_11, %c0_12], %12 {strides = array<i32>} : memref<16x256xf32, #tpu.memory_space<vmem>>, vector<16x256xf32>,
    } else {
    }
    %c0 = arith.constant 0 : index
    %c0_1 = arith.constant 0 : index
    %3 = vector.load %arg7[%c0, %c0_1] : memref<16x256xf32, #tpu.memory_space<vmem>>, vector<16x256xf32>
    %c0_2 = arith.constant 0 : index
    %c0_3 = arith.constant 0 : index
    %4 = vector.load %arg3[%c0_2, %c0_3] : memref<16x32xf32, #tpu.memory_space<vmem>>, vector<16x32xf32>
    %c0_4 = arith.constant 0 : index
    %c0_5 = arith.constant 0 : index
    %5 = vector.load %arg4[%c0_4, %c0_5] : memref<32x256xf32, #tpu.memory_space<vmem>>, vector<32x256xf32>
    %cst = arith.constant dense<0.000000e+00> : vector<16x256xf32>
    %6 = tpu.matmul %4, %5, %cst {dimension_numbers = #tpu.dot_dimension_numbers<[1], [0], [0], [1], [0, 0, 1, 1], [], []>} : vector<16x32xf32>, vector<32x256xf32>, vector<16x256xf32> -> vector<16x256xf32>
    %7 = arith.addf %3, %6 : vector<16x256xf32>
    %c0_6 = arith.constant 0 : index
    %c0_7 = arith.constant 0 : index
    %8 = vector.load %arg7[%c0_6, %c0_7] : memref<16x256xf32, #tpu.memory_space<vmem>>, vector<16x256xf32>
    tpu.vector_store %arg7[%c0_6, %c0_7], %7 {strides = array<i32>} : memref<16x256xf32, #tpu.memory_space<vmem>>, vector<16x256xf32>,
    %c0_i32_8 = arith.constant 0 : i32
    %9 = arith.cmpi eq, %arg2, %c0_i32_8 : i32
    %10 = arith.extui %9 : i1 to i32
    %c0_i32_9 = arith.constant 0 : i32
    %11 = arith.cmpi ne, %10, %c0_i32_9 : i32
    scf.if %11 {
      %c0_10 = arith.constant 0 : index
      %c0_11 = arith.constant 0 : index
      %12 = vector.load %arg7[%c0_10, %c0_11] : memref<16x256xf32, #tpu.memory_space<vmem>>, vector<16x256xf32>
      %c0_12 = arith.constant 0 : index
      %c0_13 = arith.constant 0 : index
      %13 = vector.load %arg5[%c0_12, %c0_13] : memref<1x256xf32, #tpu.memory_space<vmem>>, vector<1x256xf32>
      %14 = vector.broadcast %13 : vector<1x256xf32> to vector<16x256xf32>
      %15 = arith.addf %12, %14 : vector<16x256xf32>
      %c0_14 = arith.constant 0 : index
      %c0_15 = arith.constant 0 : index
      %16 = vector.load %arg6[%c0_14, %c0_15] : memref<16x256xf32, #tpu.memory_space<vmem>>, vector<16x256xf32>
      tpu.vector_store %arg6[%c0_14, %c0_15], %15 {strides = array<i32>} : memref<16x256xf32, #tpu.memory_space<vmem>>, vector<16x256xf32>,
    } else {
    }
    return
  }
  func.func @transform_0(%arg0: i32, %arg1: i32, %arg2: i32) -> (i32, i32) {
    %c0_i32 = arith.constant 0 : i32
    return %arg0, %arg2 : i32, i32
  }
  func.func @transform_1(%arg0: i32, %arg1: i32, %arg2: i32) -> (i32, i32) {
    %c0_i32 = arith.constant 0 : i32
    return %arg2, %arg1 : i32, i32
  }
  func.func @transform_2(%arg0: i32, %arg1: i32, %arg2: i32) -> (i32, i32) {
    %c0_i32 = arith.constant 0 : i32
    %c0_i32_0 = arith.constant 0 : i32
    return %c0_i32, %arg1 : i32, i32
  }
  func.func @transform_3(%arg0: i32, %arg1: i32, %arg2: i32) -> (i32, i32) {
    %c0_i32 = arith.constant 0 : i32
    return %arg0, %arg1 : i32, i32
  }
}

</mosaic_0001>

<bundles_post_ra>
// kernel: tpu_custom_call.1
= control target key start
LH: loop header
LB: loop body
LE: loop exit
PB: predicated region body
PF: predicated region fallthrough
CT: control target
= control target key end

     0   :  { %8 = vsyncpa [#allocation4], 0  ;;  %s332_s0 = inlined_call_operand.hbm [shape: f32[16,32], index: 0, kind: input, shape index: {}]   ;;  %s333_s1 = inlined_call_operand.hbm [shape: f32[32,256], index: 1, kind: input, shape index: {}]   ;;  %s334_s2 = inlined_call_operand.vmem [shape: f32[1,256], index: 2, kind: input, shape index: {}]   ;;  %s335_s3 = inlined_call_operand.hbm [shape: f32[16,256], index: 3, kind: output, shape index: {}]  }
   0x1   :  { %9 = vsyncpa [#allocation7], 0 }
   0x2   :  { %10 = vsyncpa [#allocation5], 0  ;;  %s286_s12 = smov [#allocation3]  }
   0x3   :  { %s16_s13 = sshll.u32 %s286_s12, 4  ;;  %s17_s13 = int_to_ptr.vmem [resolvable:$true] %s16_s13 }
   0x4   :  { %s228_s14 = scalar_lea.vmem %s17_s13, 256  ;;  %p233_p1 = scmp.lt.s32.totalorder %s17_s13, %s17_s13 }
   0x5   :  { %p229_p0 = scmp.ne.s32.totalorder %s17_s13, %s228_s14  ;;  %p234_p2 = scmp.lt.s32.totalorder %s228_s14, %s228_s14 }
   0x7   :  { %p235_p3 = por %p234_p2, %p233_p1 }
   0x9   :  { %p236_p4 = pnand %p235_p3, %p229_p0 }
   0xb   :  { %239 = shalt.err (!%p236_p4)
}
   0xc   :  { %s287_s15 = smov 128   ;;  %s288_s16 = smov 8  }
   0xd   :  { %22 = dma.hbm_to_vmem [thread:$0]  %s332_s0, 256, %s17_s13, [#allocation4], %s287_s15, %s287_s15, %s288_s16  }
   0xe   :  { %s289_s19 = smov [#allocation6]  }
   0xf   :  { %s28_s20 = sshll.u32 %s289_s19, 4  ;;  %s29_s20 = int_to_ptr.vmem [resolvable:$true] %s28_s20 }
  0x10   :  { %s248_s21 = scalar_lea.vmem %s29_s20, 1024  ;;  %p253_p6 = scmp.lt.s32.totalorder %s29_s20, %s29_s20 }
  0x11   :  { %p249_p5 = scmp.ne.s32.totalorder %s29_s20, %s248_s21  ;;  %p254_p7 = scmp.lt.s32.totalorder %s248_s21, %s248_s21 }
  0x13   :  { %p255_p8 = por %p254_p7, %p253_p6 }
  0x15   :  { %p256_p9 = pnand %p255_p8, %p249_p5 }
  0x17   :  { %259 = shalt.err (!%p256_p9)
}
  0x18   :  { %s290_s22 = smov 256   ;;  %s291_s23 = smov 16  }
  0x19   :  { %34 = dma.hbm_to_vmem [thread:$0]  %s333_s1, 1024, %s29_s20, [#allocation7], %s290_s22, %s290_s22, %s291_s23  }
  0x1a   :  { %280 = dma.done.wait [#allocation4], 256  }
  0x1b   :  { %281 = vsyncadd [#allocation4], 4294967040 }
  0x1c   :  { %282 = dma.done.wait [#allocation7], 1024  }
  0x1d   :  { %283 = vsyncadd [#allocation7], 4294966272  ;;  %v292_v0 = vmov 0.0   ;;  %v64_v1 = vld [vmem:[#allocation6 + $0x38] sm:$0xff]  ;;  %v63_v2 = vld [vmem:[#allocation6 + $0x30] sm:$0xff]  ;;  %vm65_vm0 = vcmask 261120   ;;  %v166_v11 = vlaneseq }
  0x1e   :  { %136 = vmatprep.mubr.f32.mxu0 %v292_v0  ;;  %142 = vmatprep.mubr.f32.mxu1 %v292_v0  ;;  %v62_v3 = vld [vmem:[#allocation6 + $0x28] sm:$0xff]  ;;  %v61_v4 = vld [vmem:[#allocation6 + $0x20] sm:$0xff]  ;;  %v60_v5 = vld [vmem:[#allocation6 + $0x18] sm:$0xff]  ;;  %s293_s26 = smov [#allocation8]  }
  0x1f   :  { %96 = vmatprep.subr.mxu0 %v64_v1  ;;  %204 = vmatprep.subr.mxu1 %v64_v1  ;;  %v59_v6 = vld [vmem:[#allocation6 + $0x10] sm:$0xff]  ;;  %v58_v7 = vld [vmem:[#allocation6 + $0x8] sm:$0xff]  ;;  %v57_v8 = vld [vmem:[#allocation6] sm:$0xff]  ;;  %v167_v12 = vshrl.u32 %v166_v11, 7  ;;  %s189_s27 = sshll.u32 %s293_s26, 4  ;;  %s190_s27 = int_to_ptr.vmem [resolvable:$true] %s189_s27 }
  0x20   :  { %97 = vmatpush1.msra.mxu0 %v63_v2  ;;  %208 = vmatpush1.msra.mxu1 %v63_v2  ;;  %v55_v9 = vld [vmem:[#allocation3] sm:$0xff]  ;;  %v56_v10 = vld [vmem:[#allocation3 + $0x8] sm:$0xff]  ;;  %s260_s28 = scalar_lea.vmem %s190_s27, 512  ;;  %p265_p11 = scmp.lt.s32.totalorder %s190_s27, %s190_s27 }
  0x21   :  { %98 = vmatprep.subr.mxu0 %v62_v3  ;;  %205 = vmatprep.subr.mxu1 %v62_v3  ;;  %v168_v13 = vsub.s32 0, %v167_v12  ;;  %v164_v14 = vld [vmem:[%s334_s2] sm:$0x3]  ;;  %v172_v15 = vsub.s32 1, %v167_v12  ;;  %p261_p10 = scmp.ne.s32.totalorder %s190_s27, %s260_s28  ;;  %p266_p12 = scmp.lt.s32.totalorder %s260_s28, %s260_s28 }
  0x22   :  { %99 = vmatpush1.msra.mxu0 %v61_v4  ;;  %209 = vmatpush1.msra.mxu1 %v61_v4 }
  0x23   :  { %100 = vmatprep.subr.mxu0 %v60_v5  ;;  %206 = vmatprep.subr.mxu1 %v60_v5  ;;  %v169_v16 = vrot.slane %v164_v14, %v168_v13  ;;  %v173_v17 = vrot.slane %v164_v14, %v172_v15  ;;  %p267_p13 = por %p266_p12, %p265_p11 }
  0x24   :  { %101 = vmatpush1.msra.mxu0 %v59_v6  ;;  %210 = vmatpush1.msra.mxu1 %v59_v6 }
  0x25   :  { %102 = vmatprep.subr.mxu0 %v58_v7  ;;  %207 = vmatprep.subr.mxu1 %v58_v7  ;;  %p268_p0 = pnand %p267_p13, %p261_p10 }
  0x26   :  { %103 = vmatpush1.msra.mxu0 %v57_v8  ;;  %211 = vmatpush1.msra.mxu1 %v57_v8 }
  0x27   :  { %202 = vmatmul.mubr.msk.f32.vlgmr.msra.gmra.mxu0 %vm65_vm0, %v55_v9  ;;  %203 = vmatmul.mubr.msk.f32.vlgmr.msra.gmra.mxu1 %vm65_vm0, %v56_v10 }
  0xe7   :  { %v138_v18 = vpop.f32.mrf.mxu0  ;;  %v144_v19 = vpop.f32.mrf.mxu1 }
  0xe8   :  { %v176_v20 = vadd.f32 %v169_v16, %v138_v18  ;;  %v178_v21 = vadd.f32 %v169_v16, %v144_v19 }
  0xe9   :  { %v140_v22 = vpop.f32.mrf.mxu0  ;;  %v146_v23 = vpop.f32.mrf.mxu1 }
  0xea   :  { %180 = vst [vmem:[#allocation8] sm:$0xff] %v176_v20  ;;  %182 = vst [vmem:[#allocation8 + $0x10] sm:$0xff] %v178_v21  ;;  %v177_v24 = vadd.f32 %v173_v17, %v140_v22  ;;  %v179_v25 = vadd.f32 %v173_v17, %v146_v23 }
  0xec   :  { %181 = vst [vmem:[#allocation8 + $0x8] sm:$0xff] %v177_v24  ;;  %183 = vst [vmem:[#allocation8 + $0x18] sm:$0xff] %v179_v25 }
  0xed   :  { %271 = shalt.err (!%p268_p0)
}
  0xee   :  { %195 = dma.vmem_to_hbm [thread:$0]  %s190_s27, 512, %s335_s3, [#allocation5], %s290_s22, %s290_s22, %s291_s23  }
  0xef   :  { %284 = dma.done.wait [#allocation5], 512  }
  0xf0   :  { %285 = vsyncadd [#allocation5], 4294966784 }
  0xf1   :  { %199 = vsyncpa [#allocation4], 1 }
  0xf2   :  { %200 = vsyncpa [#allocation7], 1 }
  0xf3   :  { %201 = vsyncpa [#allocation5], 1 }

</bundles_post_ra>
